<compile_context>
chip_gen: v6e
topology: v6e:2x2x1
jax: 0.10.0
libtpu: 0.0.40
codegen_flags: <defaults>
</compile_context>

<pallas_src>
import jax
import jax.numpy as jnp
from jax.experimental import pallas as pl
from jax.experimental.pallas import tpu as pltpu

C_LOGIT_CLIP = 10.0     # AttentionDecoder use_tanh=True clipping constant
GRU_LAYERS = 2
# `e` is re-streamed from HBM every decode step -> store it in bf16 (halves the
# dominant per-step DMA) and upcast to f32 inside the kernel before any VPU/EUP work.
E_DTYPE = jnp.bfloat16


# ----------------------------------------------------------------------------
# Generation-aware VMEM budgeting / batch tiling
# ----------------------------------------------------------------------------
def _vmem_capacity_bytes():
    try:
        return int(pltpu.get_tpu_info().vmem_capacity_bytes)
    except Exception:
        return 64 * 1024 * 1024            # conservative fallback (v7x per-core)


def _vmem_limit_bytes():
    cap = _vmem_capacity_bytes()
    return min(int(cap * 0.9), 128 * 1024 * 1024)


def _batch_tile(B, N, H):
    """Pick the batch tile tb (must divide B; multiple of 8 or the full batch).

    Per-batch-row resident VMEM estimate for the step kernel:
      e block (bf16, double-buffered)        ~ 2*2*N*H
      pointer temporaries (q+e, tanh, hid*v) ~ 3*4*N*H
      mask / last_h / gru in+out             ~ small
    """
    per_row = 16 * N * H + 8 * N + 48 * H
    budget = _vmem_capacity_bytes() // 2       # headroom: weights, compiler temps
    max_tb = max(8, budget // max(per_row, 1))

    if B % 8 != 0:
        # (8,128) block rule: tile must be a multiple of 8 or the full batch.
        return B
    cands = [t for t in range(8, B + 1, 8) if B % t == 0]
    # Prefer >= 2 grid steps so the "parallel" axis can shard over v7x's two TCs.
    multi = [t for t in cands if t <= B // 2]
    if multi:
        cands = multi
    fits = [t for t in cands if t <= max_tb]
    return max(fits) if fits else min(cands)


# ----------------------------------------------------------------------------
# Kernel 1: step-invariant pointer projection  e = h_n @ Wref^T + bref
# Operates on the 2-D (B*N, H) view (reshape done at the XLA level, not in-kernel),
# stores bf16.  Call ONCE per decode sequence; reuse `e` for every step.
# ----------------------------------------------------------------------------
def pointer_precompute_kernel(h2d_ref, wref_t_ref, bref_ref, e_ref):
    e = jnp.dot(h2d_ref[...], wref_t_ref[...],
                preferred_element_type=jnp.float32)          # (rows, H) f32
    e_ref[...] = (e + bref_ref[...]).astype(e_ref.dtype)     # store bf16


def precompute_pointer_projection(h_n, prep, tb, vmem_limit):
    B, N, H = h_n.shape
    rows = tb * N
    h2d = h_n.reshape(B * N, H)            # XLA-level reshape (free)
    e2d = pl.pallas_call(
        pointer_precompute_kernel,
        out_shape=jax.ShapeDtypeStruct((B * N, H), E_DTYPE),
        grid=(B // tb,),
        in_specs=[
            pl.BlockSpec((rows, H), lambda i: (i, 0)),
            pl.BlockSpec((H, H), lambda i: (0, 0)),
            pl.BlockSpec((1, H), lambda i: (0, 0)),
        ],
        out_specs=pl.BlockSpec((rows, H), lambda i: (i, 0)),
        compiler_params=pltpu.CompilerParams(
            dimension_semantics=("parallel",),
            vmem_limit_bytes=vmem_limit),
    )(h2d, prep['wref_t'], prep['bref'])
    return e2d.reshape(B, N, H)


# ----------------------------------------------------------------------------
# Kernel 2: one decoder step
#   (precomputed bf16 `e`, gathered last-node embedding) -> 2-layer GRU step ->
#   pointer attention (tanh-clipped logits) -> masked softmax -> greedy argmax.
# ----------------------------------------------------------------------------
def decoder_step_kernel(
    e_ref, last_h_ref, mask_ref, gru_h_ref,
    w_r_ref, w_z_ref, w_in_ref, w_hn_ref,
    b_r_ref, b_z_ref, b_in_ref, b_hn_ref,
    wq_t_ref, bq_ref, v_ref,
    idx_ref, prob_ref, gru_out_ref,
):
    tb, N, H = e_ref.shape
    L = gru_h_ref.shape[0]

    last_h = last_h_ref[...]                 # (tb, H) f32
    mask = mask_ref[...]                     # (tb, N) i32

    def dot(a, w):
        return jnp.dot(a, w, preferred_element_type=jnp.float32)

    # --- 2-layer GRU, single time step.  r/z gates use fused [x;h] weights; the
    # n-gate keeps input/hidden contributions separate (r only gates the hidden term).
    # Read all previous states before any write (gru_out aliases gru_hidden in HBM).
    h_prev = [gru_h_ref[l, :, :] for l in range(L)]

    x = last_h
    new_h = []
    for l in range(L):
        h = h_prev[l]
        xh = jnp.concatenate([x, h], axis=-1)                       # (tb, 2H)
        r = jax.nn.sigmoid(dot(xh, w_r_ref[l, :, :]) + b_r_ref[l, :, :])
        z = jax.nn.sigmoid(dot(xh, w_z_ref[l, :, :]) + b_z_ref[l, :, :])
        n = jnp.tanh(dot(x, w_in_ref[l, :, :]) + b_in_ref[l, :, :]
                     + r * (dot(h, w_hn_ref[l, :, :]) + b_hn_ref[l, :, :]))
        x = (1.0 - z) * n + z * h
        new_h.append(x)
    for l in range(L):
        gru_out_ref[l, :, :] = new_h[l]

    # --- pointer attention (Bahdanau-style, tanh-clipped logits), e precomputed ----
    q = dot(x, wq_t_ref[...]) + bq_ref[...]                          # (tb, H)
    e = e_ref[...].astype(jnp.float32)                               # bf16 -> f32
    hid = jnp.tanh(q[:, None, :] + e)                                # (tb, N, H)
    # At small H the lane reduce is the right choice; for H >= 128 this could be an
    # MXU matmul against v^T instead.
    u = jnp.sum(hid * v_ref[...][None, :, :], axis=-1)               # (tb, N)
    logits = C_LOGIT_CLIP * jnp.tanh(u)

    # --- masked softmax (dim = node), clamp(min=1e-8).  NOTE: a fully-masked row
    # yields NaNs exactly like the PyTorch reference.
    neg_inf = jnp.float32(-jnp.inf)
    masked = jnp.where(mask != 0, neg_inf, logits)
    m = jnp.max(masked, axis=1, keepdims=True)
    exps = jnp.exp(masked - m)
    probs = exps / jnp.sum(exps, axis=1, keepdims=True)
    probs = jnp.maximum(probs, 1e-8)

    # --- greedy argmax (first index of max) + gather selected probability ---------
    iota_n = jax.lax.broadcasted_iota(jnp.int32, (tb, N), 1)
    pmax = jnp.max(probs, axis=1, keepdims=True)
    idx = jnp.min(jnp.where(probs == pmax, iota_n, N), axis=1, keepdims=True)
    sel = (iota_n == idx).astype(jnp.float32)
    prob = jnp.sum(probs * sel, axis=1, keepdims=True)

    idx_ref[...] = idx.astype(jnp.int32)
    prob_ref[...] = prob


_WEIGHT_NAMES = ('w_r', 'w_z', 'w_in', 'w_hn',
                 'b_r', 'b_z', 'b_in', 'b_hn', 'wq_t', 'bq', 'v')


def decoder_step(e, last_h, gru_hidden, mask, prep, tb, vmem_limit):
    """One decode step; `e` / `prep` / `last_h` gather are hoisted into the wrapper."""
    B, N, H = e.shape
    L = gru_hidden.shape[0]
    grid = (B // tb,)

    def _const_spec(arr):
        nd = arr.ndim
        return pl.BlockSpec(arr.shape, lambda i, _nd=nd: (0,) * _nd)

    in_specs = [
        pl.BlockSpec((tb, N, H), lambda i: (i, 0, 0)),   # e (bf16)
        pl.BlockSpec((tb, H), lambda i: (i, 0)),         # last_h
        pl.BlockSpec((tb, N), lambda i: (i, 0)),         # mask
        pl.BlockSpec((L, tb, H), lambda i: (0, i, 0)),   # gru_hidden
    ] + [_const_spec(prep[name]) for name in _WEIGHT_NAMES]

    out_specs = (
        pl.BlockSpec((tb, 1), lambda i: (i, 0)),         # idx
        pl.BlockSpec((tb, 1), lambda i: (i, 0)),         # prob
        pl.BlockSpec((L, tb, H), lambda i: (0, i, 0)),   # new gru_hidden
    )

    idx, prob, gru_new = pl.pallas_call(
        decoder_step_kernel,
        out_shape=(
            jax.ShapeDtypeStruct((B, 1), jnp.int32),
            jax.ShapeDtypeStruct((B, 1), jnp.float32),
            jax.ShapeDtypeStruct((L, B, H), jnp.float32),
        ),
        grid=grid,
        in_specs=in_specs,
        out_specs=out_specs,
        input_output_aliases={3: 2},   # gru_hidden updated in place
        compiler_params=pltpu.CompilerParams(
            dimension_semantics=("parallel",),
            vmem_limit_bytes=vmem_limit),
    )(e, last_h, mask, gru_hidden, *[prep[name] for name in _WEIGHT_NAMES])
    return idx, prob, gru_new


# ----------------------------------------------------------------------------
# One-time weight preparation (pre-transposed, r/z gates fused over [x;h]).
# In a real decode loop call this once and reuse the result for every step.
# ----------------------------------------------------------------------------
def prepare_params(params):
    H = params['wq'].shape[0]
    L = GRU_LAYERS

    def per_layer(w_ih, w_hh, b_ih, b_hh):
        W_ir, W_iz, W_in = w_ih[:H], w_ih[H:2 * H], w_ih[2 * H:]
        W_hr, W_hz, W_hn = w_hh[:H], w_hh[H:2 * H], w_hh[2 * H:]
        return (
            jnp.concatenate([W_ir.T, W_hr.T], axis=0),   # (2H, H): [x;h] @ w_r
            jnp.concatenate([W_iz.T, W_hz.T], axis=0),   # (2H, H): [x;h] @ w_z
            W_in.T, W_hn.T,                              # n-gate stays split
            b_ih[:, :H] + b_hh[:, :H],                   # fused r bias
            b_ih[:, H:2 * H] + b_hh[:, H:2 * H],         # fused z bias
            b_ih[:, 2 * H:],                             # n bias (input side)
            b_hh[:, 2 * H:],                             # n bias (hidden side)
        )

    layers = [per_layer(params[f'w_ih{l}'].astype(jnp.float32),
                        params[f'w_hh{l}'].astype(jnp.float32),
                        params[f'b_ih{l}'].astype(jnp.float32),
                        params[f'b_hh{l}'].astype(jnp.float32))
              for l in range(L)]
    stacked = [jnp.stack([layers[l][k] for l in range(L)]) for k in range(8)]
    w_r, w_z, w_in, w_hn, b_r, b_z, b_in, b_hn = stacked

    return {
        'w_r': w_r, 'w_z': w_z, 'w_in': w_in, 'w_hn': w_hn,
        'b_r': b_r, 'b_z': b_z, 'b_in': b_in, 'b_hn': b_hn,
        'wq_t': params['wq'].astype(jnp.float32).T,
        'bq': params['bq'].astype(jnp.float32),
        'wref_t': params['wref'].astype(jnp.float32).T,
        'bref': params['bref'].astype(jnp.float32),
        'v': params['v'].astype(jnp.float32),
    }


# ----------------------------------------------------------------------------
# Top-level forward (matches SequencialDecoder.forward semantics, greedy decode)
# ----------------------------------------------------------------------------
@jax.jit
def sequencial_decoder_forward(h_n, last_node, gru_hidden, mask, params):
    h_n = h_n.astype(jnp.float32)
    gru_hidden = gru_hidden.astype(jnp.float32)
    last_node = last_node.astype(jnp.int32)
    mask = mask.astype(jnp.int32)

    B, N, H = h_n.shape
    tb = _batch_tile(B, N, H)
    vmem_limit = _vmem_limit_bytes()

    prep = prepare_params(params)                                # hoist out of loops
    e = precompute_pointer_projection(h_n, prep, tb, vmem_limit)  # once per sequence
    # Gather the last-node embedding OUTSIDE the kernel (tiny XLA gather) so the step
    # kernel never streams the full (B, N, H) h_n block from HBM.
    last_h = jnp.take_along_axis(h_n, last_node[:, :, None], axis=1)[:, 0, :]

    idx, prob, gru_new = decoder_step(e, last_h, gru_hidden, mask, prep, tb, vmem_limit)
    return idx, prob[:, 0], gru_new


# ----------------------------------------------------------------------------
# Pure-JAX reference (mirrors the PyTorch module semantics, f32 end-to-end)
# ----------------------------------------------------------------------------
def reference_forward(h_n, last_node, gru_hidden, mask, params):
    B, N, H = h_n.shape
    last_h = jnp.take_along_axis(h_n, last_node[:, :, None], axis=1)[:, 0, :]

    def gru_cell(x, h, w_ih, w_hh, b_ih, b_hh):
        gi = x @ w_ih.T + b_ih
        gh = h @ w_hh.T + b_hh
        r = jax.nn.sigmoid(gi[:, :H] + gh[:, :H])
        z = jax.nn.sigmoid(gi[:, H:2 * H] + gh[:, H:2 * H])
        n = jnp.tanh(gi[:, 2 * H:] + r * gh[:, 2 * H:])
        return (1.0 - z) * n + z * h

    h0 = gru_cell(last_h, gru_hidden[0], params['w_ih0'], params['w_hh0'],
                  params['b_ih0'], params['b_hh0'])
    h1 = gru_cell(h0, gru_hidden[1], params['w_ih1'], params['w_hh1'],
                  params['b_ih1'], params['b_hh1'])

    q = h1 @ params['wq'].T + params['bq']
    e = jnp.einsum('bnh,kh->bnk', h_n, params['wref']) + params['bref'][:, None, :]
    u = jnp.sum(jnp.tanh(q[:, None, :] + e) * params['v'][:, None, :], axis=-1)
    logits = C_LOGIT_CLIP * jnp.tanh(u)
    masked = jnp.where(mask != 0, -jnp.inf, logits)
    probs = jax.nn.softmax(masked, axis=1)
    probs = jnp.maximum(probs, 1e-8)
    idx = jnp.argmax(probs, axis=1)[:, None]
    prob = jnp.take_along_axis(probs, idx, axis=1)[:, 0]
    return idx.astype(jnp.int32), prob, jnp.stack([h0, h1], axis=0)


# ----------------------------------------------------------------------------
if __name__ == "__main__":
    B, N, H, L = 2, 8, 32, 2

    key = jax.random.PRNGKey(0)
    keys = jax.random.split(key, 20)
    s = 1.0 / jnp.sqrt(jnp.float32(H))

    def u(k, shape):
        return jax.random.uniform(k, shape, jnp.float32, -s, s)

    params = {
        # GRU layer 0
        'w_ih0': u(keys[0], (3 * H, H)), 'w_hh0': u(keys[1], (3 * H, H)),
        'b_ih0': u(keys[2], (1, 3 * H)), 'b_hh0': u(keys[3], (1, 3 * H)),
        # GRU layer 1
        'w_ih1': u(keys[4], (3 * H, H)), 'w_hh1': u(keys[5], (3 * H, H)),
        'b_ih1': u(keys[6], (1, 3 * H)), 'b_hh1': u(keys[7], (1, 3 * H)),
        # Pointer (AttentionDecoder): Linear query, Conv1d(k=1) ref, vector v
        'wq': u(keys[8], (H, H)), 'bq': u(keys[9], (1, H)),
        'wref': u(keys[10], (H, H)), 'bref': u(keys[11], (1, H)),
        'v': u(keys[12], (1, H)),
    }

    h_n = jax.random.normal(keys[13], (B, N, H), jnp.float32)
    gru_hidden = jax.random.normal(keys[14], (L, B, H), jnp.float32)
    last_node = jax.random.randint(keys[15], (B, 1), 0, N, jnp.int32)
    # mask the previously visited node (deterministic, never all-masked)
    mask = (jax.lax.broadcasted_iota(jnp.int32, (B, N), 1) == last_node).astype(jnp.int32)

    idx, prob, gru_new = sequencial_decoder_forward(h_n, last_node, gru_hidden, mask, params)
    jax.block_until_ready((idx, prob, gru_new))

    ridx, rprob, rgru = reference_forward(h_n, last_node, gru_hidden, mask, params)
    assert jnp.all(idx == ridx), (idx, ridx)
    # prob tolerance accounts for `e` being stored in bf16 (GRU state stays f32).
    assert jnp.allclose(prob, rprob, atol=2e-2), (prob, rprob)
    assert jnp.allclose(gru_new, rgru, atol=1e-4)

    print("KERNEL_OK")
</pallas_src>

<mosaic_0001>
module attributes {stable_mosaic.version = 11 : i64} {
  func.func @pointer_precompute_kernel(%arg0: i32, %arg1: memref<16x32xf32, #tpu.memory_space<vmem>>, %arg2: memref<32x32xf32, #tpu.memory_space<vmem>>, %arg3: memref<1x32xf32, #tpu.memory_space<vmem>>, %arg4: memref<16x32xbf16, #tpu.memory_space<vmem>>) attributes {dimension_semantics = [#tpu.dimension_semantics<parallel>], iteration_bounds = array<i64: 1>, scalar_prefetch = 0 : i64, scratch_operands = 0 : i64, tpu.core_type = #tpu.core_type<tc>, window_params = [{transform_indices = @transform_0, window_bounds = array<i64: 16, 32>}, {pipeline_mode = #tpu.pipeline_mode<synchronous>, transform_indices = @transform_1, window_bounds = array<i64: 32, 32>}, {pipeline_mode = #tpu.pipeline_mode<synchronous>, transform_indices = @transform_2, window_bounds = array<i64: 1, 32>}, {transform_indices = @transform_3, window_bounds = array<i64: 16, 32>}]} {
    %c0 = arith.constant 0 : index
    %c0_0 = arith.constant 0 : index
    %0 = vector.load %arg1[%c0, %c0_0] : memref<16x32xf32, #tpu.memory_space<vmem>>, vector<16x32xf32>
    %c0_1 = arith.constant 0 : index
    %c0_2 = arith.constant 0 : index
    %1 = vector.load %arg2[%c0_1, %c0_2] : memref<32x32xf32, #tpu.memory_space<vmem>>, vector<32x32xf32>
    %cst = arith.constant dense<0.000000e+00> : vector<16x32xf32>
    %2 = tpu.matmul %0, %1, %cst {dimension_numbers = #tpu.dot_dimension_numbers<[1], [0], [0], [1], [0, 0, 1, 1], [], []>} : vector<16x32xf32>, vector<32x32xf32>, vector<16x32xf32> -> vector<16x32xf32>
    %c0_3 = arith.constant 0 : index
    %c0_4 = arith.constant 0 : index
    %3 = vector.load %arg3[%c0_3, %c0_4] : memref<1x32xf32, #tpu.memory_space<vmem>>, vector<1x32xf32>
    %4 = vector.broadcast %3 : vector<1x32xf32> to vector<16x32xf32>
    %5 = arith.addf %2, %4 : vector<16x32xf32>
    %6 = arith.truncf %5 : vector<16x32xf32> to vector<16x32xbf16>
    %c0_5 = arith.constant 0 : index
    %c0_6 = arith.constant 0 : index
    %7 = vector.load %arg4[%c0_5, %c0_6] : memref<16x32xbf16, #tpu.memory_space<vmem>>, vector<16x32xbf16>
    tpu.vector_store %arg4[%c0_5, %c0_6], %6 {strides = array<i32>} : memref<16x32xbf16, #tpu.memory_space<vmem>>, vector<16x32xbf16>,
    return
  }
  func.func @transform_0(%arg0: i32) -> (i32, i32) {
    %c0_i32 = arith.constant 0 : i32
    %c0_i32_0 = arith.constant 0 : i32
    return %arg0, %c0_i32 : i32, i32
  }
  func.func @transform_1(%arg0: i32) -> (i32, i32) {
    %c0_i32 = arith.constant 0 : i32
    %c0_i32_0 = arith.constant 0 : i32
    %c0_i32_1 = arith.constant 0 : i32
    return %c0_i32, %c0_i32_0 : i32, i32
  }
  func.func @transform_2(%arg0: i32) -> (i32, i32) {
    %c0_i32 = arith.constant 0 : i32
    %c0_i32_0 = arith.constant 0 : i32
    %c0_i32_1 = arith.constant 0 : i32
    return %c0_i32, %c0_i32_0 : i32, i32
  }
  func.func @transform_3(%arg0: i32) -> (i32, i32) {
    %c0_i32 = arith.constant 0 : i32
    %c0_i32_0 = arith.constant 0 : i32
    return %arg0, %c0_i32 : i32, i32
  }
}

module attributes {stable_mosaic.version = 11 : i64} {
  func.func @decoder_step_kernel(%arg0: i32, %arg1: memref<2x8x32xbf16, #tpu.memory_space<vmem>>, %arg2: memref<2x32xf32, #tpu.memory_space<vmem>>, %arg3: memref<2x8xi32, #tpu.memory_space<vmem>>, %arg4: memref<2x2x32xf32, #tpu.memory_space<vmem>>, %arg5: memref<2x64x32xf32, #tpu.memory_space<vmem>>, %arg6: memref<2x64x32xf32, #tpu.memory_space<vmem>>, %arg7: memref<2x32x32xf32, #tpu.memory_space<vmem>>, %arg8: memref<2x32x32xf32, #tpu.memory_space<vmem>>, %arg9: memref<2x1x32xf32, #tpu.memory_space<vmem>>, %arg10: memref<2x1x32xf32, #tpu.memory_space<vmem>>, %arg11: memref<2x1x32xf32, #tpu.memory_space<vmem>>, %arg12: memref<2x1x32xf32, #tpu.memory_space<vmem>>, %arg13: memref<32x32xf32, #tpu.memory_space<vmem>>, %arg14: memref<1x32xf32, #tpu.memory_space<vmem>>, %arg15: memref<1x32xf32, #tpu.memory_space<vmem>>, %arg16: memref<2x1xi32, #tpu.memory_space<vmem>>, %arg17: memref<2x1xf32, #tpu.memory_space<vmem>>, %arg18: memref<2x2x32xf32, #tpu.memory_space<vmem>>) attributes {dimension_semantics = [#tpu.dimension_semantics<parallel>], iteration_bounds = array<i64: 1>, scalar_prefetch = 0 : i64, scratch_operands = 0 : i64, tpu.core_type = #tpu.core_type<tc>, window_params = [{transform_indices = @transform_0, window_bounds = array<i64: 2, 8, 32>}, {transform_indices = @transform_1, window_bounds = array<i64: 2, 32>}, {transform_indices = @transform_2, window_bounds = array<i64: 2, 8>}, {transform_indices = @transform_3, window_bounds = array<i64: 2, 2, 32>}, {pipeline_mode = #tpu.pipeline_mode<synchronous>, transform_indices = @transform_4, window_bounds = array<i64: 2, 64, 32>}, {pipeline_mode = #tpu.pipeline_mode<synchronous>, transform_indices = @transform_5, window_bounds = array<i64: 2, 64, 32>}, {pipeline_mode = #tpu.pipeline_mode<synchronous>, transform_indices = @transform_6, window_bounds = array<i64: 2, 32, 32>}, {pipeline_mode = #tpu.pipeline_mode<synchronous>, transform_indices = @transform_7, window_bounds = array<i64: 2, 32, 32>}, {pipeline_mode = #tpu.pipeline_mode<synchronous>, transform_indices = @transform_8, window_bounds = array<i64: 2, 1, 32>}, {pipeline_mode = #tpu.pipeline_mode<synchronous>, transform_indices = @transform_9, window_bounds = array<i64: 2, 1, 32>}, {pipeline_mode = #tpu.pipeline_mode<synchronous>, transform_indices = @transform_10, window_bounds = array<i64: 2, 1, 32>}, {pipeline_mode = #tpu.pipeline_mode<synchronous>, transform_indices = @transform_11, window_bounds = array<i64: 2, 1, 32>}, {pipeline_mode = #tpu.pipeline_mode<synchronous>, transform_indices = @transform_12, window_bounds = array<i64: 32, 32>}, {pipeline_mode = #tpu.pipeline_mode<synchronous>, transform_indices = @transform_13, window_bounds = array<i64: 1, 32>}, {pipeline_mode = #tpu.pipeline_mode<synchronous>, transform_indices = @transform_14, window_bounds = array<i64: 1, 32>}, {transform_indices = @transform_15, window_bounds = array<i64: 2, 1>}, {transform_indices = @transform_16, window_bounds = array<i64: 2, 1>}, {transform_indices = @transform_17, window_bounds = array<i64: 2, 2, 32>}]} {
    %c0 = arith.constant 0 : index
    %c0_0 = arith.constant 0 : index
    %0 = vector.load %arg2[%c0, %c0_0] : memref<2x32xf32, #tpu.memory_space<vmem>>, vector<2x32xf32>
    %c0_1 = arith.constant 0 : index
    %c0_2 = arith.constant 0 : index
    %1 = vector.load %arg3[%c0_1, %c0_2] : memref<2x8xi32, #tpu.memory_space<vmem>>, vector<2x8xi32>
    %c0_3 = arith.constant 0 : index
    %c0_4 = arith.constant 0 : index
    %c0_5 = arith.constant 0 : index
    %2 = vector.load %arg4[%c0_3, %c0_4, %c0_5] : memref<2x2x32xf32, #tpu.memory_space<vmem>>, vector<1x2x32xf32>
    %3 = vector.shape_cast %2 : vector<1x2x32xf32> to vector<2x32xf32>
    %c1 = arith.constant 1 : index
    %c0_6 = arith.constant 0 : index
    %c0_7 = arith.constant 0 : index
    %4 = vector.load %arg4[%c1, %c0_6, %c0_7] : memref<2x2x32xf32, #tpu.memory_space<vmem>>, vector<1x2x32xf32>
    %5 = vector.shape_cast %4 : vector<1x2x32xf32> to vector<2x32xf32>
    %6 = tpu.concatenate %0, %3 in 1 : vector<2x32xf32>, vector<2x32xf32> -> vector<2x64xf32>
    %c0_8 = arith.constant 0 : index
    %c0_9 = arith.constant 0 : index
    %c0_10 = arith.constant 0 : index
    %7 = vector.load %arg5[%c0_8, %c0_9, %c0_10] : memref<2x64x32xf32, #tpu.memory_space<vmem>>, vector<1x64x32xf32>
    %8 = vector.shape_cast %7 : vector<1x64x32xf32> to vector<64x32xf32>
    %cst = arith.constant dense<0.000000e+00> : vector<2x32xf32>
    %9 = tpu.matmul %6, %8, %cst {dimension_numbers = #tpu.dot_dimension_numbers<[1], [0], [0], [1], [0, 0, 1, 1], [], []>} : vector<2x64xf32>, vector<64x32xf32>, vector<2x32xf32> -> vector<2x32xf32>
    %c0_11 = arith.constant 0 : index
    %c0_12 = arith.constant 0 : index
    %c0_13 = arith.constant 0 : index
    %10 = vector.load %arg9[%c0_11, %c0_12, %c0_13] : memref<2x1x32xf32, #tpu.memory_space<vmem>>, vector<1x1x32xf32>
    %11 = vector.shape_cast %10 : vector<1x1x32xf32> to vector<1x32xf32>
    %12 = vector.broadcast %11 : vector<1x32xf32> to vector<2x32xf32>
    %13 = arith.addf %9, %12 : vector<2x32xf32>
    %14 = arith.negf %13 : vector<2x32xf32>
    %15 = math.exp %14 : vector<2x32xf32>
    %cst_14 = arith.constant 1.000000e+00 : f32
    %16 = vector.broadcast %cst_14 : f32 to vector<2x32xf32>
    %17 = arith.addf %16, %15 : vector<2x32xf32>
    %18 = arith.divf %16, %17 : vector<2x32xf32>
    %c0_15 = arith.constant 0 : index
    %c0_16 = arith.constant 0 : index
    %c0_17 = arith.constant 0 : index
    %19 = vector.load %arg6[%c0_15, %c0_16, %c0_17] : memref<2x64x32xf32, #tpu.memory_space<vmem>>, vector<1x64x32xf32>
    %20 = vector.shape_cast %19 : vector<1x64x32xf32> to vector<64x32xf32>
    %cst_18 = arith.constant dense<0.000000e+00> : vector<2x32xf32>
    %21 = tpu.matmul %6, %20, %cst_18 {dimension_numbers = #tpu.dot_dimension_numbers<[1], [0], [0], [1], [0, 0, 1, 1], [], []>} : vector<2x64xf32>, vector<64x32xf32>, vector<2x32xf32> -> vector<2x32xf32>
    %c0_19 = arith.constant 0 : index
    %c0_20 = arith.constant 0 : index
    %c0_21 = arith.constant 0 : index
    %22 = vector.load %arg10[%c0_19, %c0_20, %c0_21] : memref<2x1x32xf32, #tpu.memory_space<vmem>>, vector<1x1x32xf32>
    %23 = vector.shape_cast %22 : vector<1x1x32xf32> to vector<1x32xf32>
    %24 = vector.broadcast %23 : vector<1x32xf32> to vector<2x32xf32>
    %25 = arith.addf %21, %24 : vector<2x32xf32>
    %26 = arith.negf %25 : vector<2x32xf32>
    %27 = math.exp %26 : vector<2x32xf32>
    %cst_22 = arith.constant 1.000000e+00 : f32
    %28 = vector.broadcast %cst_22 : f32 to vector<2x32xf32>
    %29 = arith.addf %28, %27 : vector<2x32xf32>
    %30 = arith.divf %28, %29 : vector<2x32xf32>
    %c0_23 = arith.constant 0 : index
    %c0_24 = arith.constant 0 : index
    %c0_25 = arith.constant 0 : index
    %31 = vector.load %arg7[%c0_23, %c0_24, %c0_25] : memref<2x32x32xf32, #tpu.memory_space<vmem>>, vector<1x32x32xf32>
    %32 = vector.shape_cast %31 : vector<1x32x32xf32> to vector<32x32xf32>
    %cst_26 = arith.constant dense<0.000000e+00> : vector<2x32xf32>
    %33 = tpu.matmul %0, %32, %cst_26 {dimension_numbers = #tpu.dot_dimension_numbers<[1], [0], [0], [1], [0, 0, 1, 1], [], []>} : vector<2x32xf32>, vector<32x32xf32>, vector<2x32xf32> -> vector<2x32xf32>
    %c0_27 = arith.constant 0 : index
    %c0_28 = arith.constant 0 : index
    %c0_29 = arith.constant 0 : index
    %34 = vector.load %arg11[%c0_27, %c0_28, %c0_29] : memref<2x1x32xf32, #tpu.memory_space<vmem>>, vector<1x1x32xf32>
    %35 = vector.shape_cast %34 : vector<1x1x32xf32> to vector<1x32xf32>
    %36 = vector.broadcast %35 : vector<1x32xf32> to vector<2x32xf32>
    %37 = arith.addf %33, %36 : vector<2x32xf32>
    %c0_30 = arith.constant 0 : index
    %c0_31 = arith.constant 0 : index
    %c0_32 = arith.constant 0 : index
    %38 = vector.load %arg8[%c0_30, %c0_31, %c0_32] : memref<2x32x32xf32, #tpu.memory_space<vmem>>, vector<1x32x32xf32>
    %39 = vector.shape_cast %38 : vector<1x32x32xf32> to vector<32x32xf32>
    %cst_33 = arith.constant dense<0.000000e+00> : vector<2x32xf32>
    %40 = tpu.matmul %3, %39, %cst_33 {dimension_numbers = #tpu.dot_dimension_numbers<[1], [0], [0], [1], [0, 0, 1, 1], [], []>} : vector<2x32xf32>, vector<32x32xf32>, vector<2x32xf32> -> vector<2x32xf32>
    %c0_34 = arith.constant 0 : index
    %c0_35 = arith.constant 0 : index
    %c0_36 = arith.constant 0 : index
    %41 = vector.load %arg12[%c0_34, %c0_35, %c0_36] : memref<2x1x32xf32, #tpu.memory_space<vmem>>, vector<1x1x32xf32>
    %42 = vector.shape_cast %41 : vector<1x1x32xf32> to vector<1x32xf32>
    %43 = vector.broadcast %42 : vector<1x32xf32> to vector<2x32xf32>
    %44 = arith.addf %40, %43 : vector<2x32xf32>
    %45 = arith.mulf %18, %44 : vector<2x32xf32>
    %46 = arith.addf %37, %45 : vector<2x32xf32>
    %47 = math.tanh %46 : vector<2x32xf32>
    %cst_37 = arith.constant 1.000000e+00 : f32
    %48 = vector.broadcast %cst_37 : f32 to vector<2x32xf32>
    %49 = arith.subf %48, %30 : vector<2x32xf32>
    %50 = arith.mulf %49, %47 : vector<2x32xf32>
    %51 = arith.mulf %30, %3 : vector<2x32xf32>
    %52 = arith.addf %50, %51 : vector<2x32xf32>
    %53 = tpu.concatenate %52, %5 in 1 : vector<2x32xf32>, vector<2x32xf32> -> vector<2x64xf32>
    %c1_38 = arith.constant 1 : index
    %c0_39 = arith.constant 0 : index
    %c0_40 = arith.constant 0 : index
    %54 = vector.load %arg5[%c1_38, %c0_39, %c0_40] : memref<2x64x32xf32, #tpu.memory_space<vmem>>, vector<1x64x32xf32>
    %55 = vector.shape_cast %54 : vector<1x64x32xf32> to vector<64x32xf32>
    %cst_41 = arith.constant dense<0.000000e+00> : vector<2x32xf32>
    %56 = tpu.matmul %53, %55, %cst_41 {dimension_numbers = #tpu.dot_dimension_numbers<[1], [0], [0], [1], [0, 0, 1, 1], [], []>} : vector<2x64xf32>, vector<64x32xf32>, vector<2x32xf32> -> vector<2x32xf32>
    %c1_42 = arith.constant 1 : index
    %c0_43 = arith.constant 0 : index
    %c0_44 = arith.constant 0 : index
    %57 = vector.load %arg9[%c1_42, %c0_43, %c0_44] : memref<2x1x32xf32, #tpu.memory_space<vmem>>, vector<1x1x32xf32>
    %58 = vector.shape_cast %57 : vector<1x1x32xf32> to vector<1x32xf32>
    %59 = vector.broadcast %58 : vector<1x32xf32> to vector<2x32xf32>
    %60 = arith.addf %56, %59 : vector<2x32xf32>
    %61 = arith.negf %60 : vector<2x32xf32>
    %62 = math.exp %61 : vector<2x32xf32>
    %cst_45 = arith.constant 1.000000e+00 : f32
    %63 = vector.broadcast %cst_45 : f32 to vector<2x32xf32>
    %64 = arith.addf %63, %62 : vector<2x32xf32>
    %65 = arith.divf %63, %64 : vector<2x32xf32>
    %c1_46 = arith.constant 1 : index
    %c0_47 = arith.constant 0 : index
    %c0_48 = arith.constant 0 : index
    %66 = vector.load %arg6[%c1_46, %c0_47, %c0_48] : memref<2x64x32xf32, #tpu.memory_space<vmem>>, vector<1x64x32xf32>
    %67 = vector.shape_cast %66 : vector<1x64x32xf32> to vector<64x32xf32>
    %cst_49 = arith.constant dense<0.000000e+00> : vector<2x32xf32>
    %68 = tpu.matmul %53, %67, %cst_49 {dimension_numbers = #tpu.dot_dimension_numbers<[1], [0], [0], [1], [0, 0, 1, 1], [], []>} : vector<2x64xf32>, vector<64x32xf32>, vector<2x32xf32> -> vector<2x32xf32>
    %c1_50 = arith.constant 1 : index
    %c0_51 = arith.constant 0 : index
    %c0_52 = arith.constant 0 : index
    %69 = vector.load %arg10[%c1_50, %c0_51, %c0_52] : memref<2x1x32xf32, #tpu.memory_space<vmem>>, vector<1x1x32xf32>
    %70 = vector.shape_cast %69 : vector<1x1x32xf32> to vector<1x32xf32>
    %71 = vector.broadcast %70 : vector<1x32xf32> to vector<2x32xf32>
    %72 = arith.addf %68, %71 : vector<2x32xf32>
    %73 = arith.negf %72 : vector<2x32xf32>
    %74 = math.exp %73 : vector<2x32xf32>
    %cst_53 = arith.constant 1.000000e+00 : f32
    %75 = vector.broadcast %cst_53 : f32 to vector<2x32xf32>
    %76 = arith.addf %75, %74 : vector<2x32xf32>
    %77 = arith.divf %75, %76 : vector<2x32xf32>
    %c1_54 = arith.constant 1 : index
    %c0_55 = arith.constant 0 : index
    %c0_56 = arith.constant 0 : index
    %78 = vector.load %arg7[%c1_54, %c0_55, %c0_56] : memref<2x32x32xf32, #tpu.memory_space<vmem>>, vector<1x32x32xf32>
    %79 = vector.shape_cast %78 : vector<1x32x32xf32> to vector<32x32xf32>
    %cst_57 = arith.constant dense<0.000000e+00> : vector<2x32xf32>
    %80 = tpu.matmul %52, %79, %cst_57 {dimension_numbers = #tpu.dot_dimension_numbers<[1], [0], [0], [1], [0, 0, 1, 1], [], []>} : vector<2x32xf32>, vector<32x32xf32>, vector<2x32xf32> -> vector<2x32xf32>
    %c1_58 = arith.constant 1 : index
    %c0_59 = arith.constant 0 : index
    %c0_60 = arith.constant 0 : index
    %81 = vector.load %arg11[%c1_58, %c0_59, %c0_60] : memref<2x1x32xf32, #tpu.memory_space<vmem>>, vector<1x1x32xf32>
    %82 = vector.shape_cast %81 : vector<1x1x32xf32> to vector<1x32xf32>
    %83 = vector.broadcast %82 : vector<1x32xf32> to vector<2x32xf32>
    %84 = arith.addf %80, %83 : vector<2x32xf32>
    %c1_61 = arith.constant 1 : index
    %c0_62 = arith.constant 0 : index
    %c0_63 = arith.constant 0 : index
    %85 = vector.load %arg8[%c1_61, %c0_62, %c0_63] : memref<2x32x32xf32, #tpu.memory_space<vmem>>, vector<1x32x32xf32>
    %86 = vector.shape_cast %85 : vector<1x32x32xf32> to vector<32x32xf32>
    %cst_64 = arith.constant dense<0.000000e+00> : vector<2x32xf32>
    %87 = tpu.matmul %5, %86, %cst_64 {dimension_numbers = #tpu.dot_dimension_numbers<[1], [0], [0], [1], [0, 0, 1, 1], [], []>} : vector<2x32xf32>, vector<32x32xf32>, vector<2x32xf32> -> vector<2x32xf32>
    %c1_65 = arith.constant 1 : index
    %c0_66 = arith.constant 0 : index
    %c0_67 = arith.constant 0 : index
    %88 = vector.load %arg12[%c1_65, %c0_66, %c0_67] : memref<2x1x32xf32, #tpu.memory_space<vmem>>, vector<1x1x32xf32>
    %89 = vector.shape_cast %88 : vector<1x1x32xf32> to vector<1x32xf32>
    %90 = vector.broadcast %89 : vector<1x32xf32> to vector<2x32xf32>
    %91 = arith.addf %87, %90 : vector<2x32xf32>
    %92 = arith.mulf %65, %91 : vector<2x32xf32>
    %93 = arith.addf %84, %92 : vector<2x32xf32>
    %94 = math.tanh %93 : vector<2x32xf32>
    %cst_68 = arith.constant 1.000000e+00 : f32
    %95 = vector.broadcast %cst_68 : f32 to vector<2x32xf32>
    %96 = arith.subf %95, %77 : vector<2x32xf32>
    %97 = arith.mulf %96, %94 : vector<2x32xf32>
    %98 = arith.mulf %77, %5 : vector<2x32xf32>
    %99 = arith.addf %97, %98 : vector<2x32xf32>
    %c0_69 = arith.constant 0 : index
    %c0_70 = arith.constant 0 : index
    %c0_71 = arith.constant 0 : index
    %100 = vector.load %arg18[%c0_69, %c0_70, %c0_71] : memref<2x2x32xf32, #tpu.memory_space<vmem>>, vector<1x2x32xf32>
    %101 = vector.shape_cast %100 : vector<1x2x32xf32> to vector<2x32xf32>
    %102 = vector.shape_cast %52 : vector<2x32xf32> to vector<1x2x32xf32>
    tpu.vector_store %arg18[%c0_69, %c0_70, %c0_71], %102 {strides = array<i32>} : memref<2x2x32xf32, #tpu.memory_space<vmem>>, vector<1x2x32xf32>,
    %c1_72 = arith.constant 1 : index
    %c0_73 = arith.constant 0 : index
    %c0_74 = arith.constant 0 : index
    %103 = vector.load %arg18[%c1_72, %c0_73, %c0_74] : memref<2x2x32xf32, #tpu.memory_space<vmem>>, vector<1x2x32xf32>
    %104 = vector.shape_cast %103 : vector<1x2x32xf32> to vector<2x32xf32>
    %105 = vector.shape_cast %99 : vector<2x32xf32> to vector<1x2x32xf32>
    tpu.vector_store %arg18[%c1_72, %c0_73, %c0_74], %105 {strides = array<i32>} : memref<2x2x32xf32, #tpu.memory_space<vmem>>, vector<1x2x32xf32>,
    %c0_75 = arith.constant 0 : index
    %c0_76 = arith.constant 0 : index
    %106 = vector.load %arg13[%c0_75, %c0_76] : memref<32x32xf32, #tpu.memory_space<vmem>>, vector<32x32xf32>
    %cst_77 = arith.constant dense<0.000000e+00> : vector<2x32xf32>
    %107 = tpu.matmul %99, %106, %cst_77 {dimension_numbers = #tpu.dot_dimension_numbers<[1], [0], [0], [1], [0, 0, 1, 1], [], []>} : vector<2x32xf32>, vector<32x32xf32>, vector<2x32xf32> -> vector<2x32xf32>
    %c0_78 = arith.constant 0 : index
    %c0_79 = arith.constant 0 : index
    %108 = vector.load %arg14[%c0_78, %c0_79] : memref<1x32xf32, #tpu.memory_space<vmem>>, vector<1x32xf32>
    %109 = vector.broadcast %108 : vector<1x32xf32> to vector<2x32xf32>
    %110 = arith.addf %107, %109 : vector<2x32xf32>
    %c0_80 = arith.constant 0 : index
    %c0_81 = arith.constant 0 : index
    %c0_82 = arith.constant 0 : index
    %111 = vector.load %arg1[%c0_80, %c0_81, %c0_82] : memref<2x8x32xbf16, #tpu.memory_space<vmem>>, vector<2x8x32xbf16>
    %112 = arith.extf %111 : vector<2x8x32xbf16> to vector<2x8x32xf32>
    %113 = vector.shape_cast %110 : vector<2x32xf32> to vector<2x1x32xf32>
    %114 = vector.broadcast %113 : vector<2x1x32xf32> to vector<2x8x32xf32>
    %115 = arith.addf %114, %112 : vector<2x8x32xf32>
    %116 = math.tanh %115 : vector<2x8x32xf32>
    %c0_83 = arith.constant 0 : index
    %c0_84 = arith.constant 0 : index
    %117 = vector.load %arg15[%c0_83, %c0_84] : memref<1x32xf32, #tpu.memory_space<vmem>>, vector<1x32xf32>
    %118 = vector.shape_cast %117 : vector<1x32xf32> to vector<1x1x32xf32>
    %119 = vector.broadcast %118 : vector<1x1x32xf32> to vector<2x8x32xf32>
    %120 = arith.mulf %116, %119 : vector<2x8x32xf32>
    %cst_85 = arith.constant dense<0.000000e+00> : vector<2x8xf32>
    %121 = vector.multi_reduction <add>, %120, %cst_85 [2] : vector<2x8x32xf32> to vector<2x8xf32>
    %122 = math.tanh %121 : vector<2x8xf32>
    %cst_86 = arith.constant 1.000000e+01 : f32
    %123 = vector.broadcast %cst_86 : f32 to vector<2x8xf32>
    %124 = arith.mulf %123, %122 : vector<2x8xf32>
    %c0_i32 = arith.constant 0 : i32
    %125 = vector.broadcast %c0_i32 : i32 to vector<2x8xi32>
    %126 = arith.cmpi ne, %1, %125 : vector<2x8xi32>
    %cst_87 = arith.constant 0xFF800000 : f32
    %127 = vector.broadcast %cst_87 : f32 to vector<2x8xf32>
    %128 = arith.select %126, %127, %124 : vector<2x8xi1>, vector<2x8xf32>
    %cst_88 = arith.constant dense<0xFF800000> : vector<2xf32>
    %129 = vector.multi_reduction <maximumf>, %128, %cst_88 [1] : vector<2x8xf32> to vector<2xf32>
    %130 = vector.shape_cast %129 : vector<2xf32> to vector<2x1xf32>
    %131 = vector.broadcast %130 : vector<2x1xf32> to vector<2x8xf32>
    %132 = arith.subf %128, %131 : vector<2x8xf32>
    %133 = math.exp %132 : vector<2x8xf32>
    %cst_89 = arith.constant dense<0.000000e+00> : vector<2xf32>
    %134 = vector.multi_reduction <add>, %133, %cst_89 [1] : vector<2x8xf32> to vector<2xf32>
    %135 = vector.shape_cast %134 : vector<2xf32> to vector<2x1xf32>
    %136 = vector.broadcast %135 : vector<2x1xf32> to vector<2x8xf32>
    %137 = arith.divf %133, %136 : vector<2x8xf32>
    %cst_90 = arith.constant 9.99999993E-9 : f32
    %138 = vector.broadcast %cst_90 : f32 to vector<2x8xf32>
    %139 = arith.maximumf %137, %138 : vector<2x8xf32>
    %140 = tpu.iota {dimensions = array<i32: 1>} : vector<2x8xi32>
    %cst_91 = arith.constant dense<0xFF800000> : vector<2xf32>
    %141 = vector.multi_reduction <maximumf>, %139, %cst_91 [1] : vector<2x8xf32> to vector<2xf32>
    %142 = vector.shape_cast %141 : vector<2xf32> to vector<2x1xf32>
    %143 = vector.broadcast %142 : vector<2x1xf32> to vector<2x8xf32>
    %144 = arith.cmpf oeq, %139, %143 : vector<2x8xf32>
    %c8_i32 = arith.constant 8 : i32
    %145 = vector.broadcast %c8_i32 : i32 to vector<2x8xi32>
    %146 = arith.select %144, %140, %145 : vector<2x8xi1>, vector<2x8xi32>
    %cst_92 = arith.constant dense<2147483647> : vector<2xi32>
    %147 = vector.multi_reduction <minsi>, %146, %cst_92 [1] : vector<2x8xi32> to vector<2xi32>
    %148 = vector.shape_cast %147 : vector<2xi32> to vector<2x1xi32>
    %149 = vector.broadcast %148 : vector<2x1xi32> to vector<2x8xi32>
    %150 = arith.cmpi eq, %140, %149 : vector<2x8xi32>
    %151 = arith.extui %150 : vector<2x8xi1> to vector<2x8xi32>
    %152 = arith.sitofp %151 : vector<2x8xi32> to vector<2x8xf32>
    %153 = arith.mulf %139, %152 : vector<2x8xf32>
    %cst_93 = arith.constant dense<0.000000e+00> : vector<2xf32>
    %154 = vector.multi_reduction <add>, %153, %cst_93 [1] : vector<2x8xf32> to vector<2xf32>
    %155 = vector.shape_cast %154 : vector<2xf32> to vector<2x1xf32>
    %c0_94 = arith.constant 0 : index
    %c0_95 = arith.constant 0 : index
    %156 = vector.load %arg16[%c0_94, %c0_95] : memref<2x1xi32, #tpu.memory_space<vmem>>, vector<2x1xi32>
    tpu.vector_store %arg16[%c0_94, %c0_95], %148 {strides = array<i32>} : memref<2x1xi32, #tpu.memory_space<vmem>>, vector<2x1xi32>,
    %c0_96 = arith.constant 0 : index
    %c0_97 = arith.constant 0 : index
    %157 = vector.load %arg17[%c0_96, %c0_97] : memref<2x1xf32, #tpu.memory_space<vmem>>, vector<2x1xf32>
    tpu.vector_store %arg17[%c0_96, %c0_97], %155 {strides = array<i32>} : memref<2x1xf32, #tpu.memory_space<vmem>>, vector<2x1xf32>,
    return
  }
  func.func @transform_0(%arg0: i32) -> (i32, i32, i32) {
    %c0_i32 = arith.constant 0 : i32
    %c0_i32_0 = arith.constant 0 : i32
    %c0_i32_1 = arith.constant 0 : i32
    return %arg0, %c0_i32, %c0_i32_0 : i32, i32, i32
  }
  func.func @transform_1(%arg0: i32) -> (i32, i32) {
    %c0_i32 = arith.constant 0 : i32
    %c0_i32_0 = arith.constant 0 : i32
    return %arg0, %c0_i32 : i32, i32
  }
  func.func @transform_2(%arg0: i32) -> (i32, i32) {
    %c0_i32 = arith.constant 0 : i32
    %c0_i32_0 = arith.constant 0 : i32
    return %arg0, %c0_i32 : i32, i32
  }
  func.func @transform_3(%arg0: i32) -> (i32, i32, i32) {
    %c0_i32 = arith.constant 0 : i32
    %c0_i32_0 = arith.constant 0 : i32
    %c0_i32_1 = arith.constant 0 : i32
    return %c0_i32, %arg0, %c0_i32_0 : i32, i32, i32
  }
  func.func @transform_4(%arg0: i32) -> (i32, i32, i32) {
    %c0_i32 = arith.constant 0 : i32
    %c0_i32_0 = arith.constant 0 : i32
    %c0_i32_1 = arith.constant 0 : i32
    %c0_i32_2 = arith.constant 0 : i32
    return %c0_i32, %c0_i32_0, %c0_i32_1 : i32, i32, i32
  }
  func.func @transform_5(%arg0: i32) -> (i32, i32, i32) {
    %c0_i32 = arith.constant 0 : i32
    %c0_i32_0 = arith.constant 0 : i32
    %c0_i32_1 = arith.constant 0 : i32
    %c0_i32_2 = arith.constant 0 : i32
    return %c0_i32, %c0_i32_0, %c0_i32_1 : i32, i32, i32
  }
  func.func @transform_6(%arg0: i32) -> (i32, i32, i32) {
    %c0_i32 = arith.constant 0 : i32
    %c0_i32_0 = arith.constant 0 : i32
    %c0_i32_1 = arith.constant 0 : i32
    %c0_i32_2 = arith.constant 0 : i32
    return %c0_i32, %c0_i32_0, %c0_i32_1 : i32, i32, i32
  }
  func.func @transform_7(%arg0: i32) -> (i32, i32, i32) {
    %c0_i32 = arith.constant 0 : i32
    %c0_i32_0 = arith.constant 0 : i32
    %c0_i32_1 = arith.constant 0 : i32
    %c0_i32_2 = arith.constant 0 : i32
    return %c0_i32, %c0_i32_0, %c0_i32_1 : i32, i32, i32
  }
  func.func @transform_8(%arg0: i32) -> (i32, i32, i32) {
    %c0_i32 = arith.constant 0 : i32
    %c0_i32_0 = arith.constant 0 : i32
    %c0_i32_1 = arith.constant 0 : i32
    %c0_i32_2 = arith.constant 0 : i32
    return %c0_i32, %c0_i32_0, %c0_i32_1 : i32, i32, i32
  }
  func.func @transform_9(%arg0: i32) -> (i32, i32, i32) {
    %c0_i32 = arith.constant 0 : i32
    %c0_i32_0 = arith.constant 0 : i32
    %c0_i32_1 = arith.constant 0 : i32
    %c0_i32_2 = arith.constant 0 : i32
    return %c0_i32, %c0_i32_0, %c0_i32_1 : i32, i32, i32
  }
  func.func @transform_10(%arg0: i32) -> (i32, i32, i32) {
    %c0_i32 = arith.constant 0 : i32
    %c0_i32_0 = arith.constant 0 : i32
    %c0_i32_1 = arith.constant 0 : i32
    %c0_i32_2 = arith.constant 0 : i32
    return %c0_i32, %c0_i32_0, %c0_i32_1 : i32, i32, i32
  }
  func.func @transform_11(%arg0: i32) -> (i32, i32, i32) {
    %c0_i32 = arith.constant 0 : i32
    %c0_i32_0 = arith.constant 0 : i32
    %c0_i32_1 = arith.constant 0 : i32
    %c0_i32_2 = arith.constant 0 : i32
    return %c0_i32, %c0_i32_0, %c0_i32_1 : i32, i32, i32
  }
  func.func @transform_12(%arg0: i32) -> (i32, i32) {
    %c0_i32 = arith.constant 0 : i32
    %c0_i32_0 = arith.constant 0 : i32
    %c0_i32_1 = arith.constant 0 : i32
    return %c0_i32, %c0_i32_0 : i32, i32
  }
  func.func @transform_13(%arg0: i32) -> (i32, i32) {
    %c0_i32 = arith.constant 0 : i32
    %c0_i32_0 = arith.constant 0 : i32
    %c0_i32_1 = arith.constant 0 : i32
    return %c0_i32, %c0_i32_0 : i32, i32
  }
  func.func @transform_14(%arg0: i32) -> (i32, i32) {
    %c0_i32 = arith.constant 0 : i32
    %c0_i32_0 = arith.constant 0 : i32
    %c0_i32_1 = arith.constant 0 : i32
    return %c0_i32, %c0_i32_0 : i32, i32
  }
  func.func @transform_15(%arg0: i32) -> (i32, i32) {
    %c0_i32 = arith.constant 0 : i32
    %c0_i32_0 = arith.constant 0 : i32
    return %arg0, %c0_i32 : i32, i32
  }
  func.func @transform_16(%arg0: i32) -> (i32, i32) {
    %c0_i32 = arith.constant 0 : i32
    %c0_i32_0 = arith.constant 0 : i32
    return %arg0, %c0_i32 : i32, i32
  }
  func.func @transform_17(%arg0: i32) -> (i32, i32, i32) {
    %c0_i32 = arith.constant 0 : i32
    %c0_i32_0 = arith.constant 0 : i32
    %c0_i32_1 = arith.constant 0 : i32
    return %c0_i32, %arg0, %c0_i32_0 : i32, i32, i32
  }
}

</mosaic_0001>

<bundles_post_ra>
// kernel: sequencial_decoder_forward.2
= control target key start
LH: loop header
LB: loop body
LE: loop exit
PB: predicated region body
PF: predicated region fallthrough
CT: control target
= control target key end

     0   :  { %vm27_vm0 = vcmask 261120   ;;  %vm117_vm1 = vcmask 257024   ;;  %s197_s1 = inlined_call_operand.vmem [shape: f32[32,32], index: 1, kind: input, shape index: {}]   ;;  %s198_s0 = inlined_call_operand.vmem [shape: f32[16,32], index: 0, kind: input, shape index: {}]   ;;  %s199_s2 = inlined_call_operand.vmem [shape: f32[1,32], index: 2, kind: input, shape index: {}]   ;;  %s200_s3 = inlined_call_operand.vmem [shape: bf16[16,32], index: 3, kind: output, shape index: {}]  }
   0x1   :  { %v19_v0 = vld [vmem:[%s197_s1 + $0x18] sm:$0xff]  ;;  %v18_v1 = vld [vmem:[%s197_s1 + $0x10] sm:$0xff]  ;;  %v14_v2 = vld [vmem:[%s198_s0] sm:$0xff] }
   0x2   :  { %137 = vmatprep.subr.mxu0 %v19_v0  ;;  %v17_v3 = vld [vmem:[%s197_s1 + $0x8] sm:$0xff]  ;;  %145 = vmatprep.mubr.msk.f32.mxu0 %vm27_vm0, %v14_v2  ;;  %v16_v4 = vld [vmem:[%s197_s1] sm:$0xff] }
   0x3   :  { %138 = vmatpush3.msra.mxu0 %v19_v0  ;;  %v15_v5 = vld [vmem:[%s198_s0 + $0x8] sm:$0xff]  ;;  %v124_v6 = vld [vmem:[%s199_s2] ss:$0 sm:$0xff] }
   0x4   :  { %139 = vmatprep.subr.mxu0 %v18_v1 }
   0x5   :  { %140 = vmatpush3.msra.mxu0 %v18_v1 }
   0x6   :  { %141 = vmatprep.subr.mxu0 %v17_v3 }
   0x7   :  { %142 = vmatpush3.msra.mxu0 %v17_v3 }
   0x8   :  { %143 = vmatprep.subr.mxu0 %v16_v4 }
   0x9   :  { %144 = vmatpush3.msra.mxu0 %v16_v4 }
   0xa   :  { %146 = vmatmul.mubr.msk.f32.vlgmr.msra.gmra.mxu0 %vm27_vm0, %v15_v5 }
  0xca   :  { %v147_v7 = vpop.f32.mrf.mxu0 }
  0xcb   :  { %v106_v8 = vadd.f32 %v147_v7, %v124_v6 }
  0xcc   :  { %v100_v9 = vpop.f32.mrf.mxu0 }
  0xcd   :  { %v130_v10 = vpack.c.bf16 %v106_v8, %v106_v8  ;;  %v101_v11 = vadd.f32 %v124_v6, %v100_v9 }
  0xcf   :  { %119 = vst.msk [vmem:[%s200_s3 + $0x4] sm:$0xf] %vm117_vm1, %v130_v10  ;;  %v129_v12 = vpack.c.bf16 %v101_v11, %v101_v11 }
  0xd1   :  { %118 = vst.msk [vmem:[%s200_s3] sm:$0xf] %vm117_vm1, %v129_v12 }

// kernel: sequencial_decoder_forward.3
= control target key start
LH: loop header
LB: loop body
LE: loop exit
PB: predicated region body
PF: predicated region fallthrough
CT: control target
= control target key end

     0   :  { %v1302_v1 = vmov 0.0   ;;  %s1303_s18 = smov 32   ;;  %vm1304_vm0 = vmmov 0   ;;  %vm62_vm1 = vcmask 261120   ;;  %vm79_vm2 = vcmask 523264   ;;  %s1712_s3 = inlined_call_operand.vmem [shape: f32[2,2,32], index: 3, kind: input, shape index: {}, may-alias: {3,17}]   ;;  %s1713_s4 = inlined_call_operand.vmem [shape: f32[2,64,32], index: 4, kind: input, shape index: {}]   ;;  %s1714_s5 = inlined_call_operand.vmem [shape: f32[2,64,32], index: 5, kind: input, shape index: {}]   ;;  %s1715_s1 = inlined_call_operand.vmem [shape: f32[2,32], index: 1, kind: input, shape index: {}]   ;;  %s1716_s7 = inlined_call_operand.vmem [shape: f32[2,32,32], index: 7, kind: input, shape index: {}]   ;;  %s1717_s6 = inlined_call_operand.vmem [shape: f32[2,32,32], index: 6, kind: input, shape index: {}]   ;;  %s1718_s8 = inlined_call_operand.vmem [shape: f32[2,1,32], index: 8, kind: input, shape index: {}]   ;;  %s1719_s9 = inlined_call_operand.vmem [shape: f32[2,1,32], index: 9, kind: input, shape index: {}]   ;;  %s1720_s11 = inlined_call_operand.vmem [shape: f32[2,1,32], index: 11, kind: input, shape index: {}]   ;;  %s1721_s10 = inlined_call_operand.vmem [shape: f32[2,1,32], index: 10, kind: input, shape index: {}]   ;;  %s1722_s17 = inlined_call_operand.vmem [shape: f32[2,2,32], index: 17, kind: output, shape index: {2}, may-alias: {3,17}]   ;;  %s1723_s12 = inlined_call_operand.vmem [shape: f32[32,32], index: 12, kind: input, shape index: {}]   ;;  %s1724_s13 = inlined_call_operand.vmem [shape: f32[1,32], index: 13, kind: input, shape index: {}]   ;;  %s1725_s0 = inlined_call_operand.vmem [shape: bf16[2,8,32], index: 0, kind: input, shape index: {}]   ;;  %s1726_s14 = inlined_call_operand.vmem [shape: f32[1,32], index: 14, kind: input, shape index: {}]   ;;  %s1727_s2 = inlined_call_operand.vmem [shape: s32[2,8], index: 2, kind: input, shape index: {}]   ;;  %s1728_s15 = inlined_call_operand.vmem [shape: s32[2,1], index: 15, kind: output, shape index: {0}]   ;;  %s1729_s16 = inlined_call_operand.vmem [shape: f32[2,1], index: 16, kind: output, shape index: {1}]  }
   0x1   :  { %1732 = sst [smem:[#allocation2_spill]] %s1712_s3  ;;  %1135 = vmatprep.subr.mxu0 %v1302_v1  ;;  %1154 = vmatprep.subr.mxu1 %v1302_v1  ;;  %v166_v3 = vld [vmem:[%s1714_s5 + $0x38] sm:$0xff]  ;;  %v165_v5 = vld [vmem:[%s1714_s5 + $0x30] sm:$0xff]  ;;  %v164_v7 = vld [vmem:[%s1714_s5 + $0x28] sm:$0xff]  ;;  %vm796_vm3 = vcmask 254976   ;;  %vm957_vm4 = vcmask 1041409  }
   0x2   :  { %1733 = sst [smem:[#allocation3_spill]] %s1713_s4  ;;  %1155 = vmatpush3.msra.mxu1 %v166_v3  ;;  %v163_v9 = vld [vmem:[%s1714_s5 + $0x20] sm:$0xff]  ;;  %v162_v11 = vld [vmem:[%s1714_s5 + $0x18] sm:$0xff]  ;;  %v161_v13 = vld [vmem:[%s1714_s5 + $0x10] sm:$0xff]  ;;  %1151 = vmatprep.mubr.msk.f32.mxu0 %vm1304_vm0, %v1302_v1  ;;  %vm961_vm6 = vcmask 58368   ;;  %vm1001_vm9 = vcmask 1024  }
   0x3   :  { %s1734_s26 = sld [smem:[#allocation2_spill]]  ;;  %1156 = vmatprep.subr.mxu1 %v1302_v1  ;;  %v160_v15 = vld [vmem:[%s1714_s5 + $0x8] sm:$0xff]  ;;  %v159_v17 = vld [vmem:[%s1714_s5] sm:$0xff]  ;;  %1170 = vmatprep.mubr.msk.f32.mxu1 %vm1304_vm0, %v1302_v1  ;;  %v337_v21 = vld [vmem:[%s1716_s7 + $0x18] sm:$0xff] }
   0x4   :  { %s1735_s29 = sld [smem:[#allocation3_spill]]  ;;  %1157 = vmatpush3.msra.mxu1 %v165_v5  ;;  %v53_v19 = vld [vmem:[%s1715_s1] sm:$0x3]  ;;  %v253_v22 = vld [vmem:[%s1717_s6 + $0x18] sm:$0xff]  ;;  %v336_v24 = vld [vmem:[%s1716_s7 + $0x10] sm:$0xff] }
   0x5   :  { %1158 = vmatprep.subr.mxu1 %v1302_v1  ;;  %v252_v25 = vld [vmem:[%s1717_s6 + $0x10] sm:$0xff]  ;;  %v335_v26 = vld [vmem:[%s1716_s7 + $0x8] sm:$0xff]  ;;  %v334_v28 = vld [vmem:[%s1716_s7] sm:$0xff] }
   0x6   :  { %1159 = vmatpush3.msra.mxu1 %v164_v7  ;;  %v251_v27 = vld [vmem:[%s1717_s6 + $0x8] sm:$0xff]  ;;  %v250_v29 = vld [vmem:[%s1717_s6] sm:$0xff]  ;;  %v1046_v31 = vld [vmem:[%s1714_s5 + $0x78] sm:$0xff] }
   0x7   :  { %1160 = vmatprep.subr.mxu1 %v1302_v1  ;;  %v1045_v33 = vld [vmem:[%s1714_s5 + $0x70] sm:$0xff]  ;;  %v1044_v35 = vld [vmem:[%s1714_s5 + $0x68] sm:$0xff]  ;;  %v1043_v37 = vld [vmem:[%s1714_s5 + $0x60] sm:$0xff] }
   0x8   :  { %1161 = vmatpush3.msra.mxu1 %v163_v9  ;;  %v1042_v39 = vld [vmem:[%s1714_s5 + $0x58] sm:$0xff]  ;;  %v1041_v41 = vld [vmem:[%s1714_s5 + $0x50] sm:$0xff]  ;;  %v1040_v43 = vld [vmem:[%s1714_s5 + $0x48] sm:$0xff] }
   0x9   :  { %v1399_v0 = vld [vmem:[%s1734_s26] sm:$0x3]  ;;  %1162 = vmatprep.subr.mxu1 %v1302_v1  ;;  %v1470_v18 = vld [vmem:[%s1734_s26 + $0x2] sm:$0x3] }
   0xa   :  { %v71_v2 = vld [vmem:[%s1735_s29 + $0x38] sm:$0xff]  ;;  %59 = vrot.lane.b32.xlu0 %v1399_v0, %s1303_s18  ;;  %v70_v4 = vld [vmem:[%s1735_s29 + $0x30] sm:$0xff]  ;;  %v69_v6 = vld [vmem:[%s1735_s29 + $0x28] sm:$0xff]  ;;  %1163 = vmatpush3.msra.mxu1 %v162_v11 }
   0xb   :  { %1136 = vmatpush3.msra.mxu0 %v71_v2  ;;  %v68_v8 = vld [vmem:[%s1735_s29 + $0x20] sm:$0xff]  ;;  %v67_v10 = vld [vmem:[%s1735_s29 + $0x18] sm:$0xff]  ;;  %v66_v12 = vld [vmem:[%s1735_s29 + $0x10] sm:$0xff]  ;;  %1164 = vmatprep.subr.mxu1 %v1302_v1 }
   0xc   :  { %1137 = vmatprep.subr.mxu0 %v1302_v1  ;;  %v65_v14 = vld [vmem:[%s1735_s29 + $0x8] sm:$0xff]  ;;  %1165 = vmatpush3.msra.mxu1 %v161_v13  ;;  %v64_v16 = vld [vmem:[%s1735_s29] sm:$0xff]  ;;  %v1034_v30 = vld [vmem:[%s1735_s29 + $0x78] sm:$0xff] }
   0xd   :  { %1138 = vmatpush3.msra.mxu0 %v70_v4  ;;  %1166 = vmatprep.subr.mxu1 %v1302_v1  ;;  %v1033_v32 = vld [vmem:[%s1735_s29 + $0x70] sm:$0xff]  ;;  %v1032_v34 = vld [vmem:[%s1735_s29 + $0x68] sm:$0xff]  ;;  %v1031_v36 = vld [vmem:[%s1735_s29 + $0x60] sm:$0xff] }
   0xe   :  { %1139 = vmatprep.subr.mxu0 %v1302_v1  ;;  %1167 = vmatpush3.msra.mxu1 %v160_v15  ;;  %v1030_v38 = vld [vmem:[%s1735_s29 + $0x58] sm:$0xff]  ;;  %v1029_v40 = vld [vmem:[%s1735_s29 + $0x50] sm:$0xff]  ;;  %v1028_v42 = vld [vmem:[%s1735_s29 + $0x48] sm:$0xff] }
   0xf   :  { %1140 = vmatpush3.msra.mxu0 %v69_v6  ;;  %1168 = vmatprep.subr.mxu1 %v1302_v1  ;;  %v1027_v44 = vld [vmem:[%s1735_s29 + $0x40] sm:$0xff] }
  0x10   :  { %1141 = vmatprep.subr.mxu0 %v1302_v1  ;;  %1169 = vmatpush3.msra.mxu1 %v159_v17  ;;  %v1039_v45 = vld [vmem:[%s1714_s5 + $0x40] sm:$0xff] }
  0x11   :  { %1142 = vmatpush3.msra.mxu0 %v68_v8  ;;  %1184 = vmatprep.subr.mxu1 %v1302_v1  ;;  %v1017_v46 = vld [vmem:[%s1718_s8] ss:$0 sm:$0xff] }
  0x12   :  { %1143 = vmatprep.subr.mxu0 %v1302_v1  ;;  %425 = vrot.lane.b32.xlu0 %v1470_v18, %s1303_s18  ;;  %v1020_v53 = vld [vmem:[%s1719_s9] ss:$0 sm:$0xff] }
  0x13   :  { %1144 = vmatpush3.msra.mxu0 %v67_v10  ;;  %v1025_v63 = vld [vmem:[%s1720_s11] ss:$0 sm:$0xff] }
  0x14   :  { %1145 = vmatprep.subr.mxu0 %v1302_v1  ;;  %v1023_v2 = vld [vmem:[%s1721_s10] ss:$0 sm:$0xff] }
  0x15   :  { %1146 = vmatpush3.msra.mxu0 %v66_v12 }
  0x16   :  { %1147 = vmatprep.subr.mxu0 %v1302_v1 }
  0x17   :  { %1148 = vmatpush3.msra.mxu0 %v65_v14 }
  0x18   :  { %1149 = vmatprep.subr.mxu0 %v1302_v1 }
  0x19   :  { %1150 = vmatpush3.msra.mxu0 %v64_v16  ;;  %v1054_v16 = vld [vmem:[%s1717_s6 + $0x38] sm:$0xff] }
  0x1a   :  { %1173 = vmatprep.subr.mxu0 %v1302_v1 }
  0x7c   :  { %v60_v20 = vpop.permute.xlu0 %59 }
  0x7d   :  { %v63_v23 = vsel %vm62_vm1, %v53_v19, %v60_v20  ;;  %v1060_v20 = vld [vmem:[%s1716_s7 + $0x30] sm:$0xff] }
  0x7e   :  { %1152 = vmatmul.mubr.msk.f32.vlgmr.msra.gmra.mxu0 %vm79_vm2, %v63_v23  ;;  %1171 = vmatmul.mubr.msk.f32.vlgmr.msra.gmra.mxu1 %vm79_vm2, %v63_v23  ;;  %v1051_v23 = vld [vmem:[%s1717_s6 + $0x20] sm:$0xff] }
  0x7f   :  { %1185 = vmatpush3.msra.mxu1 %v337_v21  ;;  %1174 = vmatpush3.msra.mxu0 %v253_v22  ;;  %v1052_v21 = vld [vmem:[%s1717_s6 + $0x28] sm:$0xff] }
  0x80   :  { %1186 = vmatprep.subr.mxu1 %v1302_v1  ;;  %1175 = vmatprep.subr.mxu0 %v1302_v1  ;;  %v1059_v22 = vld [vmem:[%s1716_s7 + $0x28] sm:$0xff] }
  0x81   :  { %1187 = vmatpush3.msra.mxu1 %v336_v24  ;;  %1176 = vmatpush3.msra.mxu0 %v252_v25  ;;  %v1058_v24 = vld [vmem:[%s1716_s7 + $0x20] sm:$0xff]  ;;  %v803_v25 = vld [vmem:[%s1723_s12 + $0x18] sm:$0xff] }
  0x82   :  { %1188 = vmatprep.subr.mxu1 %v1302_v1  ;;  %1177 = vmatprep.subr.mxu0 %v1302_v1 }
  0x83   :  { %1189 = vmatpush3.msra.mxu1 %v335_v26  ;;  %1178 = vmatpush3.msra.mxu0 %v251_v27  ;;  %v802_v26 = vld [vmem:[%s1723_s12 + $0x10] sm:$0xff]  ;;  %v801_v27 = vld [vmem:[%s1723_s12 + $0x8] sm:$0xff] }
  0x84   :  { %1190 = vmatprep.subr.mxu1 %v1302_v1  ;;  %1192 = vmatprep.mubr.msk.f32.mxu1 %vm1304_vm0, %v1302_v1  ;;  %v426_v14 = vpop.permute.xlu0 %425 }
  0x85   :  { %1191 = vmatpush3.msra.mxu1 %v334_v28  ;;  %1179 = vmatprep.subr.mxu0 %v1302_v1  ;;  %v800_v28 = vld [vmem:[%s1723_s12] sm:$0xff] }
  0x86   :  { %1193 = vmatmul.mubr.msk.f32.vlgmr.msra.gmra.mxu1 %vm62_vm1, %v1399_v0  ;;  %1180 = vmatpush3.msra.mxu0 %v250_v29  ;;  %v1036_v29 = vld [vmem:[%s1718_s8 + $0x1] ss:$0 sm:$0xff] }
  0x87   :  { %1181 = vmatprep.mubr.msk.f32.mxu0 %vm1304_vm0, %v1302_v1  ;;  %1195 = vmatprep.subr.mxu0 %v1302_v1 }
  0x88   :  { %1182 = vmatmul.mubr.msk.f32.vlgmr.msra.gmra.mxu0 %vm62_vm1, %v53_v19  ;;  %1214 = vmatprep.subr.mxu1 %v1302_v1  ;;  %v1061_v19 = vld [vmem:[%s1716_s7 + $0x38] sm:$0xff] }
  0x89   :  { %1211 = vmatprep.mubr.msk.f32.mxu0 %vm1304_vm0, %v1302_v1  ;;  %1230 = vmatprep.mubr.msk.f32.mxu1 %vm1304_vm0, %v1302_v1 }
  0x8a   :  { %1196 = vmatpush3.msra.mxu0 %v1034_v30  ;;  %1215 = vmatpush3.msra.mxu1 %v1046_v31 }
  0x8b   :  { %1197 = vmatprep.subr.mxu0 %v1302_v1  ;;  %1216 = vmatprep.subr.mxu1 %v1302_v1 }
  0x8c   :  { %1198 = vmatpush3.msra.mxu0 %v1033_v32  ;;  %1217 = vmatpush3.msra.mxu1 %v1045_v33 }
  0x8d   :  { %1199 = vmatprep.subr.mxu0 %v1302_v1  ;;  %1218 = vmatprep.subr.mxu1 %v1302_v1 }
  0x8e   :  { %1200 = vmatpush3.msra.mxu0 %v1032_v34  ;;  %1219 = vmatpush3.msra.mxu1 %v1044_v35 }
  0x8f   :  { %1201 = vmatprep.subr.mxu0 %v1302_v1  ;;  %1220 = vmatprep.subr.mxu1 %v1302_v1 }
  0x90   :  { %1202 = vmatpush3.msra.mxu0 %v1031_v36  ;;  %1221 = vmatpush3.msra.mxu1 %v1043_v37  ;;  %v1048_v36 = vld [vmem:[%s1719_s9 + $0x1] ss:$0 sm:$0xff] }
  0x91   :  { %1203 = vmatprep.subr.mxu0 %v1302_v1  ;;  %1222 = vmatprep.subr.mxu1 %v1302_v1 }
  0x92   :  { %1204 = vmatpush3.msra.mxu0 %v1030_v38  ;;  %1223 = vmatpush3.msra.mxu1 %v1042_v39 }
  0x93   :  { %1205 = vmatprep.subr.mxu0 %v1302_v1  ;;  %1224 = vmatprep.subr.mxu1 %v1302_v1 }
  0x94   :  { %1206 = vmatpush3.msra.mxu0 %v1029_v40  ;;  %1225 = vmatpush3.msra.mxu1 %v1041_v41 }
  0x95   :  { %1207 = vmatprep.subr.mxu0 %v1302_v1  ;;  %1226 = vmatprep.subr.mxu1 %v1302_v1 }
  0x96   :  { %1208 = vmatpush3.msra.mxu0 %v1028_v42  ;;  %1227 = vmatpush3.msra.mxu1 %v1040_v43 }
  0x97   :  { %1209 = vmatprep.subr.mxu0 %v1302_v1  ;;  %1228 = vmatprep.subr.mxu1 %v1302_v1 }
  0x98   :  { %1210 = vmatpush3.msra.mxu0 %v1027_v44  ;;  %1229 = vmatpush3.msra.mxu1 %v1039_v45 }
  0x99   :  { %1233 = vmatprep.subr.mxu0 %v1302_v1  ;;  %1244 = vmatprep.subr.mxu1 %v1302_v1 }
 0x13e   :  { %v149_v47 = vpop.f32.mrf.mxu0  ;;  %v240_v48 = vpop.f32.mrf.mxu1 }
 0x13f   :  { %v150_v49 = vadd.f32 %v1017_v46, %v149_v47  ;;  %v241_v54 = vadd.f32 %v1020_v53, %v240_v48  ;;  %v1063_v46 = vld [vmem:[%s1720_s11 + $0x1] ss:$0 sm:$0xff] }
 0x140   :  { %v1153_v50 = vpop.f32.mrf.mxu0  ;;  %v1172_v51 = vpop.f32.mrf.mxu1 }
 0x141   :  { %v1019_v52 = vmul.f32 -1.442695, %v150_v49  ;;  %v1022_v58 = vmul.f32 -1.442695, %v241_v54  ;;  %v1056_v49 = vld [vmem:[%s1721_s10 + $0x1] ss:$0 sm:$0xff] }
 0x143   :  { %1270 = vpow2.f32 %v1019_v52 }
 0x144   :  { %1272 = vpow2.f32 %v1022_v58 }
 0x146   :  { %v413_v55 = vpop.f32.mrf.mxu1 }
 0x147   :  { %v414_v4 = vadd.f32 %v1025_v63, %v413_v55 }
 0x148   :  { %v330_v56 = vpop.f32.mrf.mxu0  ;;  %v1194_v57 = vpop.f32.mrf.mxu1 }
 0x149   :  { %v331_v5 = vadd.f32 %v1023_v2, %v330_v56 }
 0x14a   :  { %v1183_v59 = vpop.f32.mrf.mxu0 }
 0x150   :  { %v1271_v60 = vpop.eup %1270 }
 0x151   :  { %v156_v61 = vadd.f32 1.0, %v1271_v60  ;;  %v1273_v62 = vpop.eup %1272  ;;  %v1305_v60 = vmov 1966171168  }
 0x152   :  { %v247_v3 = vadd.f32 1.0, %v1273_v62  ;;  %v892_v62 = vlaneseq }
 0x153   :  { %1274 = vrcp.f32 %v156_v61  ;;  %v890_v61 = vunpack.c.l.s4 %v1305_v60 }
 0x154   :  { %1276 = vrcp.f32 %v247_v3  ;;  %v893_v2 = vshrl.u32 %v892_v62, 7  ;;  %v1066_v3 = vld [vmem:[%s1724_s13] ss:$0 sm:$0xff] }
 0x155   :  { %v891_v63 = vunpack.c.0.s8 %v890_v61 }
 0x160   :  { %v1275_v6 = vpop.eup %1274 }
 0x161   :  { %v417_v7 = vmul.f32 %v1275_v6, %v414_v4  ;;  %v1277_v9 = vpop.eup %1276  ;;  %v894_v4 = vsub.s32 %v891_v63, %v893_v2  ;;  %v1071_v6 = vld [vmem:[%s1725_s0] sm:$0xff]  }
 0x162   :  { %v420_v10 = vsub.f32 1.0, %v1277_v9  ;;  %v422_v13 = vmul.f32 %v1277_v9, %v1399_v0  ;;  %v1053_v0 = vld [vmem:[%s1717_s6 + $0x30] sm:$0xff]  ;;  %v913_v9 = vsub.s32 0, %v893_v2 }
 0x163   :  { %v418_v8 = vadd.f32 %v417_v7, %v331_v5 }
 0x165   :  { %1278 = vtanh.f32 %v418_v8 }
 0x172   :  { %v1279_v11 = vpop.eup %1278 }
 0x173   :  { %v421_v12 = vmul.f32 %v1279_v11, %v420_v10  ;;  %v1072_v10 = vunpack.c.l.bf16 %v1071_v6 }
 0x175   :  { %v423_v15 = vadd.f32 %v422_v13, %v421_v12  ;;  %v1073_v13 = vunpack.c.h.bf16 %v1071_v6 }
 0x177   :  { %v428_v17 = vsel %vm62_vm1, %v423_v15, %v426_v14  ;;  %797 = vst.msk [vmem:[%s1722_s17] sm:$0x3] %vm796_vm3, %v423_v15 }
 0x178   :  { %1212 = vmatmul.mubr.msk.f32.vlgmr.msra.gmra.mxu0 %vm79_vm2, %v428_v17  ;;  %1231 = vmatmul.mubr.msk.f32.vlgmr.msra.gmra.mxu1 %vm79_vm2, %v428_v17 }
 0x179   :  { %1234 = vmatpush3.msra.mxu0 %v1054_v16  ;;  %1241 = vmatprep.mubr.msk.f32.mxu0 %vm1304_vm0, %v1302_v1 }
 0x17a   :  { %1235 = vmatprep.subr.mxu0 %v1302_v1  ;;  %1245 = vmatpush3.msra.mxu1 %v1061_v19 }
 0x17b   :  { %1236 = vmatpush3.msra.mxu0 %v1053_v0  ;;  %1246 = vmatprep.subr.mxu1 %v1302_v1  ;;  %v1068_v0 = vld [vmem:[%s1726_s14] ss:$0 sm:$0xff] }
 0x17c   :  { %1237 = vmatprep.subr.mxu0 %v1302_v1  ;;  %1247 = vmatpush3.msra.mxu1 %v1060_v20 }
 0x17d   :  { %1238 = vmatpush3.msra.mxu0 %v1052_v21  ;;  %1248 = vmatprep.subr.mxu1 %v1302_v1 }
 0x17e   :  { %1239 = vmatprep.subr.mxu0 %v1302_v1  ;;  %1249 = vmatpush3.msra.mxu1 %v1059_v22 }
 0x17f   :  { %1240 = vmatpush3.msra.mxu0 %v1051_v23  ;;  %1250 = vmatprep.subr.mxu1 %v1302_v1 }
 0x180   :  { %1242 = vmatmul.mubr.msk.f32.vlgmr.msra.gmra.mxu0 %vm62_vm1, %v423_v15  ;;  %1251 = vmatpush3.msra.mxu1 %v1058_v24 }
 0x181   :  { %1252 = vmatprep.mubr.msk.f32.mxu1 %vm1304_vm0, %v1302_v1  ;;  %1255 = vmatprep.subr.mxu0 %v1302_v1 }
 0x182   :  { %1253 = vmatmul.mubr.msk.f32.vlgmr.msra.gmra.mxu1 %vm62_vm1, %v1470_v18  ;;  %1263 = vmatprep.mubr.msk.f32.mxu0 %vm1304_vm0, %v1302_v1 }
 0x183   :  { %1256 = vmatpush3.msra.mxu0 %v803_v25 }
 0x184   :  { %1257 = vmatprep.subr.mxu0 %v1302_v1 }
 0x185   :  { %1258 = vmatpush3.msra.mxu0 %v802_v26 }
 0x186   :  { %1259 = vmatprep.subr.mxu0 %v1302_v1 }
 0x187   :  { %1260 = vmatpush3.msra.mxu0 %v801_v27 }
 0x188   :  { %1261 = vmatprep.subr.mxu0 %v1302_v1 }
 0x189   :  { %1262 = vmatpush3.msra.mxu0 %v800_v28  ;;  %v948_v28 = vand.u32 127, %v892_v62 }
 0x238   :  { %v515_v30 = vpop.f32.mrf.mxu0  ;;  %v608_v31 = vpop.f32.mrf.mxu1 }
 0x239   :  { %v516_v32 = vadd.f32 %v1036_v29, %v515_v30  ;;  %v609_v37 = vadd.f32 %v1048_v36, %v608_v31  ;;  %v951_v30 = vsub.s32 %v948_v28, %v893_v2 }
 0x23a   :  { %v1213_v33 = vpop.f32.mrf.mxu0  ;;  %v1232_v34 = vpop.f32.mrf.mxu1 }
 0x23b   :  { %v1038_v35 = vmul.f32 -1.442695, %v516_v32  ;;  %v1050_v41 = vmul.f32 -1.442695, %v609_v37  ;;  %v54_v33 = vld [vmem:[%s1727_s2] sm:$0x3] }
 0x23c   :  { %vm944_vm5 = vcmp.ne.s32.totalorder %v54_v33, 0 }
 0x23d   :  { %1280 = vpow2.f32 %v1038_v35 }
 0x23e   :  { %1282 = vpow2.f32 %v1050_v41 }
 0x240   :  { %v700_v38 = vpop.f32.mrf.mxu0 }
 0x241   :  { %v701_v51 = vadd.f32 %v1056_v49, %v700_v38 }
 0x242   :  { %v1243_v39 = vpop.f32.mrf.mxu0  ;;  %v785_v40 = vpop.f32.mrf.mxu1 }
 0x243   :  { %v786_v48 = vadd.f32 %v1063_v46, %v785_v40 }
 0x244   :  { %v1254_v42 = vpop.f32.mrf.mxu1 }
 0x24a   :  { %v1281_v43 = vpop.eup %1280 }
 0x24b   :  { %v522_v44 = vadd.f32 1.0, %v1281_v43  ;;  %v1283_v45 = vpop.eup %1282 }
 0x24c   :  { %v615_v47 = vadd.f32 1.0, %v1283_v45 }
 0x24d   :  { %1284 = vrcp.f32 %v522_v44 }
 0x24e   :  { %1286 = vrcp.f32 %v615_v47 }
 0x25a   :  { %v1285_v50 = vpop.eup %1284 }
 0x25b   :  { %v789_v52 = vmul.f32 %v1285_v50, %v786_v48  ;;  %v1287_v54 = vpop.eup %1286 }
 0x25c   :  { %v792_v55 = vsub.f32 1.0, %v1287_v54  ;;  %v794_v58 = vmul.f32 %v1287_v54, %v1470_v18 }
 0x25d   :  { %v790_v53 = vadd.f32 %v789_v52, %v701_v51 }
 0x25f   :  { %1288 = vtanh.f32 %v790_v53 }
 0x26c   :  { %v1289_v56 = vpop.eup %1288 }
 0x26d   :  { %v793_v57 = vmul.f32 %v1289_v56, %v792_v55 }
 0x26f   :  { %v795_v59 = vadd.f32 %v794_v58, %v793_v57 }
 0x271   :  { %1065 = vst.msk [vmem:[%s1722_s17 + $0x2] sm:$0x3] %vm796_vm3, %v795_v59  ;;  %1264 = vmatmul.mubr.msk.f32.vlgmr.msra.gmra.mxu0 %vm62_vm1, %v795_v59 }
 0x331   :  { %v880_v5 = vpop.f32.mrf.mxu0 }
 0x332   :  { %v881_v18 = vadd.f32 %v1066_v3, %v880_v5 }
 0x333   :  { %v1265_v7 = vpop.f32.mrf.mxu0 }
 0x334   :  { %v895_v8 = vrot.slane %v881_v18, %v894_v4 }
 0x336   :  { %v896_v11 = vcombine.high %v895_v8, %v895_v8  ;;  %v903_v12 = vrot.slane %v895_v8, %v894_v4 }
 0x338   :  { %v910_v14 = vrot.slane %v896_v11, %v894_v4  ;;  %v914_v15 = vrot.slane %v903_v12, %v913_v9 }
 0x33a   :  { %v918_v16 = vrot.slane %v910_v14, %v913_v9  ;;  %v921_v17 = vadd.f32 %v1072_v10, %v914_v15 }
 0x33c   :  { %v922_v19 = vadd.f32 %v1073_v13, %v918_v16  ;;  %1290 = vtanh.f32 %v921_v17 }
 0x33e   :  { %1292 = vtanh.f32 %v922_v19 }
 0x349   :  { %v1291_v20 = vpop.eup %1290 }
 0x34a   :  { %v932_v21 = vmul.f32 %v1291_v20, %v1068_v0 }
 0x34b   :  { %v1293_v22 = vpop.eup %1292 }
 0x34c   :  { %v934_v23 = vsel %vm62_vm1, %v932_v21, 0.0  ;;  %v933_v24 = vmul.f32 %v1293_v22, %v1068_v0 }
 0x34d   :  { %935 = vadd.xlane.f32.xlu1 %v934_v23 }
 0x34e   :  { %v937_v25 = vsel %vm62_vm1, %v933_v24, 0.0 }
 0x351   :  { %938 = vadd.xlane.f32.xlu1 %v937_v25 }
 0x3d6   :  { %v936_v26 = vpop.xlane.xlu1 %935 }
 0x3d7   :  { %1294 = vtanh.f32 %v936_v26 }
 0x3da   :  { %v939_v27 = vpop.xlane.xlu1 %938 }
 0x3db   :  { %1296 = vtanh.f32 %v939_v27 }
 0x3e4   :  { %v1295_v29 = vpop.eup %1294 }
 0x3e5   :  { %v942_v31 = vmul.f32 10.0, %v1295_v29 }
 0x3e7   :  { %v952_v35 = vrot.slane %v942_v31, %v951_v30 }
 0x3e8   :  { %v1297_v32 = vpop.eup %1296 }
 0x3e9   :  { %v943_v34 = vmul.f32 10.0, %v1297_v32 }
 0x3eb   :  { %v956_v36 = vrot.slane %v943_v34, %v951_v30 }
 0x3ed   :  { %v958_v37 = vsel %vm957_vm4, %v956_v36, %v952_v35 }
 0x3ee   :  { %v960_v38 = vsel %vm944_vm5, -inf, %v958_v37 }
 0x3ef   :  { %v962_v39 = vsel %vm961_vm6, %v960_v38, -inf }
 0x3f0   :  { %963 = vmax.xlane.f32.xlu0 %v962_v39 }
 0x479   :  { %v964_v40 = vpop.xlane.xlu0 %963 }
 0x47a   :  { %v965_v41 = vsub.f32 %v960_v38, %v964_v40 }
 0x47c   :  { %v966_v42 = vmul.f32 1.442695, %v965_v41 }
 0x47e   :  { %1298 = vpow2.f32 %v966_v42 }
 0x48b   :  { %v1299_v43 = vpop.eup %1298 }
 0x48c   :  { %v968_v44 = vsel %vm961_vm6, %v1299_v43, 0.0 }
 0x48d   :  { %969 = vadd.xlane.f32.xlu1 %v968_v44 }
 0x516   :  { %v970_v45 = vpop.xlane.xlu1 %969 }
 0x517   :  { %1300 = vrcp.f32 %v970_v45 }
 0x524   :  { %v1301_v46 = vpop.eup %1300 }
 0x525   :  { %v972_v47 = vmul.f32 %v1301_v46, %v1299_v43 }
 0x527   :  { %v973_v48 = vmax.f32 %v972_v47, 1e-08 }
 0x529   :  { %v974_v49 = vsel %vm961_vm6, %v973_v48, -inf }
 0x52a   :  { %975 = vmax.xlane.f32.xlu1 %v974_v49 }
 0x5b3   :  { %v976_v50 = vpop.xlane.xlu1 %975 }
 0x5b4   :  { %vm977_vm7 = vcmp.eq.f32.partialorder %v973_v48, %v976_v50 }
 0x5b5   :  { %v978_v51 = vsel %vm977_vm7, %v948_v28, 8 }
 0x5b6   :  { %v979_v52 = vsel %vm961_vm6, %v978_v51, 2147483647 }
 0x5b7   :  { %v981_v53 = vshra.s32 %v979_v52, 16  ;;  %v980_v55 = vand.u32 65535, %v979_v52 }
 0x5b9   :  { %v983_v54 = vcvt.s32.f32 %v981_v53  ;;  %v982_v57 = vcvt.s32.f32 %v980_v55 }
 0x5bb   :  { %984 = vmin.xlane.f32.xlu1 %v983_v54 }
 0x644   :  { %v985_v56 = vpop.xlane.xlu1 %984 }
 0x645   :  { %vm986_vm8 = vcmp.eq.f32.partialorder %v983_v54, %v985_v56  ;;  %v991_v59 = vcvt.f32.s32 %v985_v56 }
 0x646   :  { %v987_v58 = vsel %vm986_vm8, %v982_v57, inf }
 0x647   :  { %988 = vmin.xlane.f32.xlu1 %v987_v58  ;;  %v992_v61 = vshll.u32 %v991_v59, 16 }
 0x6d0   :  { %v989_v60 = vpop.xlane.xlu1 %988 }
 0x6d1   :  { %v990_v62 = vcvt.f32.s32 %v989_v60 }
 0x6d3   :  { %v993_v63 = vadd.s32 %v992_v61, %v990_v62 }
 0x6d5   :  { %vm994_vm10 = vcmp.eq.s32.totalorder %v948_v28, %v993_v63  ;;  %1002 = vst.msk [vmem:[%s1728_s15] sm:$0x3] %vm1001_vm9, %v993_v63 }
 0x6d6   :  { %v1069_v2 = vsel %vm994_vm10, 1.0, %v1302_v1 }
 0x6d7   :  { %v997_v3 = vmul.f32 %v1069_v2, %v973_v48 }
 0x6d9   :  { %v998_v4 = vsel %vm961_vm6, %v997_v3, 0.0 }
 0x6da   :  { %999 = vadd.xlane.f32.xlu1 %v998_v4 }
 0x763   :  { %v1000_v5 = vpop.xlane.xlu1 %999 }
 0x764   :  { %1003 = vst.msk [vmem:[%s1729_s16] sm:$0x3] %vm1001_vm9, %v1000_v5 }

</bundles_post_ra>
